<compile_context>
chip_gen: v7x
topology: tpu7x:2x2x1
jax: 0.10.0
libtpu: 0.0.40
codegen_flags: <defaults>
</compile_context>

<pallas_src>
import functools
import math

import jax
import jax.numpy as jnp
from jax import lax
from jax.experimental import pallas as pl
from jax.experimental.pallas import tpu as pltpu


def _round_up(x, m):
    return (x + m - 1) // m * m


# ----------------------------- Pallas kernel --------------------------------
def _patch_embed_kernel(p_ref, w_ref, b_ref, g_ref, beta_ref, o_ref, *, eps):
    """One M-tile of: conv-as-matmul + bias + LayerNorm(embed_dim).

    p_ref    : (TM, Kp)  patch tile (bf16/f32), Kp zero-padded to a %128
    w_ref    : (Kp, D)   conv weight (rows >= K are zero)        [resident]
    b_ref    : (1, D)    conv bias  (f32)                        [resident]
    g_ref    : (1, D)    LayerNorm weight (gamma, f32)           [resident]
    beta_ref : (1, D)    LayerNorm bias   (beta, f32)            [resident]
    o_ref    : (TM, D)   output tile (f32)
    """
    # MXU matmul with f32 accumulation; zero-padded K rows contribute nothing.
    y = jnp.dot(p_ref[...], w_ref[...], preferred_element_type=jnp.float32)
    y = y + b_ref[...]
    # LayerNorm over the embedding (last) dimension.
    mu = jnp.mean(y, axis=-1, keepdims=True)
    diff = y - mu
    var = jnp.mean(diff * diff, axis=-1, keepdims=True)
    y_hat = diff * lax.rsqrt(var + eps)           # rsqrt -> EUP slot (cheap)
    o_ref[...] = (y_hat * g_ref[...] + beta_ref[...]).astype(o_ref.dtype)


def _pallas_patch_embed(patches2d, w2d, bias2d, gamma2d, beta2d, *, block_m, eps):
    M_pad, Kp = patches2d.shape
    D = w2d.shape[1]
    assert M_pad % block_m == 0 and Kp % 128 == 0
    grid = (M_pad // block_m,)

    in_bytes = jnp.dtype(patches2d.dtype).itemsize
    # Double-buffered streams + resident weight, with 2x headroom; clamp so it
    # stays comfortably inside v7x's 64 MiB physical VMEM on all generations.
    vmem_need = (2 * block_m * Kp * in_bytes      # patches, double-buffered
                 + 2 * block_m * D * 4            # output, double-buffered
                 + Kp * D * in_bytes              # resident weight
                 + 3 * D * 4)                     # bias / gamma / beta
    vmem_limit = int(min(max(2 * vmem_need, 16 * 1024 * 1024),
                         48 * 1024 * 1024))

    cost = pl.CostEstimate(
        flops=2 * M_pad * Kp * D,
        transcendentals=M_pad,
        bytes_accessed=(M_pad * Kp * in_bytes + Kp * D * in_bytes
                        + M_pad * D * 4 + 3 * D * 4),
    )

    grid_spec = pltpu.PrefetchScalarGridSpec(
        num_scalar_prefetch=0,
        grid=grid,
        in_specs=[
            pl.BlockSpec((block_m, Kp), lambda i: (i, 0)),   # streamed tiles
            pl.BlockSpec((Kp, D), lambda i: (0, 0)),         # resident weight
            pl.BlockSpec((1, D), lambda i: (0, 0)),          # bias
            pl.BlockSpec((1, D), lambda i: (0, 0)),          # gamma
            pl.BlockSpec((1, D), lambda i: (0, 0)),          # beta
        ],
        out_specs=pl.BlockSpec((block_m, D), lambda i: (i, 0)),
    )

    return pl.pallas_call(
        functools.partial(_patch_embed_kernel, eps=eps),
        out_shape=jax.ShapeDtypeStruct((M_pad, D), jnp.float32),
        grid_spec=grid_spec,
        compiler_params=pltpu.CompilerParams(
            dimension_semantics=("parallel",),   # 2x on v7x's two TensorCores
            vmem_limit_bytes=vmem_limit,
        ),
        cost_estimate=cost,
    )(patches2d, w2d, bias2d, gamma2d, beta2d)


# --------------------------- host-side wrapper -------------------------------
def overlap_patch_embed(x, params, *, patch_size=7, stride=4,
                        block_m=None, compute_dtype=jnp.bfloat16, eps=1e-5):
    """x: (B, C, H, W) float32 NCHW.  Returns (tokens, H_out, W_out) where
    tokens has shape (B, H_out*W_out, embed_dim) in float32."""
    B, C, H, W = x.shape
    kh = kw = patch_size
    pad = patch_size // 2
    Ho = (H + 2 * pad - kh) // stride + 1
    Wo = (W + 2 * pad - kw) // stride + 1
    N = Ho * Wo
    M = B * N
    K = C * kh * kw

    # ---- im2col in token-major / feature-minor order (no big HBM transpose):
    # gather strided (B, Ho, Wo, C) slabs from an NHWC view and concat on the
    # channel-minor axis.  Feature order is (i, j, c).
    x_cd = jnp.transpose(x, (0, 2, 3, 1)).astype(compute_dtype)   # NHWC, bf16
    xp = jnp.pad(x_cd, ((0, 0), (pad, pad), (pad, pad), (0, 0)))
    slabs = []
    for i in range(kh):
        for j in range(kw):
            slabs.append(xp[:, i:i + stride * (Ho - 1) + 1:stride,
                               j:j + stride * (Wo - 1) + 1:stride, :])
    patches = jnp.concatenate(slabs, axis=-1)        # (B, Ho, Wo, kh*kw*C)
    patches2d = patches.reshape(M, K)
    # TODO(synk): fold this gather into the kernel (memory_space=pl.ANY +
    # per-tile DMA of the kh*kw strided row slabs) so the K-expanded patches
    # array is never materialized in HBM.

    # ---- weight (D, C, kh, kw) -> (kh, kw, C, D) -> (K, D): matches the
    # (i, j, c) feature order used above.
    w_oihw = params["proj_w"]
    D = w_oihw.shape[0]
    w2d = jnp.transpose(w_oihw, (2, 3, 1, 0)).reshape(K, D).astype(compute_dtype)

    # ---- pad K to a multiple of 128 (aligned MXU contraction) and M to a
    # multiple of the tile size (padded rows are computed then discarded).
    Kp = _round_up(K, 128)
    if block_m is None:
        block_m = min(1024, _round_up(M, 8))
    block_m = max(8, _round_up(block_m, 8))
    M_pad = _round_up(max(M, block_m), block_m)

    patches2d = jnp.pad(patches2d, ((0, M_pad - M), (0, Kp - K)))
    w2d = jnp.pad(w2d, ((0, Kp - K), (0, 0)))

    bias2d = params["proj_b"].reshape(1, D).astype(jnp.float32)
    gamma2d = params["ln_w"].reshape(1, D).astype(jnp.float32)
    beta2d = params["ln_b"].reshape(1, D).astype(jnp.float32)

    out2d = _pallas_patch_embed(patches2d, w2d, bias2d, gamma2d, beta2d,
                                block_m=block_m, eps=eps)
    # TODO(synk): for D < 128 stages, relayout the output to a lane-dense
    # (M*D/128, 128) slab to avoid masked vst; skipped because the in-kernel
    # (TM, D)->(TM*D/128, 128) reshape is layout-risky on current Mosaic.
    tokens = out2d[:M].reshape(B, N, D)
    return tokens, Ho, Wo


# ---------------------------- pure-JAX reference -----------------------------
def _reference(x, params, *, patch_size=7, stride=4, eps=1e-5):
    pad = patch_size // 2
    y = lax.conv_general_dilated(
        x, params["proj_w"], window_strides=(stride, stride),
        padding=((pad, pad), (pad, pad)),
        dimension_numbers=("NCHW", "OIHW", "NCHW"),
    ) + params["proj_b"][None, :, None, None]
    B, D, Ho, Wo = y.shape
    tok = jnp.transpose(y.reshape(B, D, Ho * Wo), (0, 2, 1))
    mu = jnp.mean(tok, axis=-1, keepdims=True)
    var = jnp.mean((tok - mu) ** 2, axis=-1, keepdims=True)
    tok = (tok - mu) * lax.rsqrt(var + eps)
    tok = tok * params["ln_w"] + params["ln_b"]
    return tok, Ho, Wo


# ---------------------------------- main --------------------------------------
if __name__ == "__main__":
    # Small shapes consistent with the module's stage-1 patch embed.
    B, C, Hin, Win = 2, 4, 16, 16
    patch_size, stride, embed_dim = 7, 4, 32

    key = jax.random.PRNGKey(0)
    kx, kw, kb, kg, kbeta = jax.random.split(key, 5)

    x = jax.random.normal(kx, (B, C, Hin, Win), dtype=jnp.float32)

    fan_in = C * patch_size * patch_size
    bound = 1.0 / math.sqrt(fan_in)
    params = {
        # Conv2d(in_chans=C, embed_dim, kernel=patch_size, stride, pad=patch//2)
        "proj_w": jax.random.uniform(
            kw, (embed_dim, C, patch_size, patch_size),
            minval=-bound, maxval=bound, dtype=jnp.float32),
        "proj_b": jax.random.uniform(
            kb, (embed_dim,), minval=-bound, maxval=bound, dtype=jnp.float32),
        # LayerNorm(embed_dim) affine (perturbed to exercise the affine path).
        "ln_w": 1.0 + 0.1 * jax.random.normal(kg, (embed_dim,), dtype=jnp.float32),
        "ln_b": 0.1 * jax.random.normal(kbeta, (embed_dim,), dtype=jnp.float32),
    }

    # block_m=16 -> M=32 tokens split over a 2-step grid (exercises pipelining).
    tokens_bf16, H_out, W_out = overlap_patch_embed(
        x, params, patch_size=patch_size, stride=stride,
        block_m=16, compute_dtype=jnp.bfloat16)
    tokens_f32, _, _ = overlap_patch_embed(
        x, params, patch_size=patch_size, stride=stride,
        block_m=16, compute_dtype=jnp.float32)
    tokens_bf16 = jax.block_until_ready(tokens_bf16)
    tokens_f32 = jax.block_until_ready(tokens_f32)

    ref_tokens, rH, rW = _reference(x, params, patch_size=patch_size, stride=stride)

    assert tokens_bf16.shape == (B, H_out * W_out, embed_dim)
    assert (H_out, W_out) == (rH, rW)
    assert jnp.allclose(tokens_f32, ref_tokens, atol=2e-2, rtol=2e-2)
    assert jnp.allclose(tokens_bf16, ref_tokens, atol=2e-2, rtol=2e-2)

    print("KERNEL_OK")
</pallas_src>

<mosaic_0001>
module attributes {stable_mosaic.version = 11 : i64} {
  func.func @_patch_embed_kernel(%arg0: i32, %arg1: memref<16x256xbf16, #tpu.memory_space<vmem>>, %arg2: memref<256x32xbf16, #tpu.memory_space<vmem>>, %arg3: memref<1x32xf32, #tpu.memory_space<vmem>>, %arg4: memref<1x32xf32, #tpu.memory_space<vmem>>, %arg5: memref<1x32xf32, #tpu.memory_space<vmem>>, %arg6: memref<16x32xf32, #tpu.memory_space<vmem>>) attributes {dimension_semantics = [#tpu.dimension_semantics<parallel>], iteration_bounds = array<i64: 2>, scalar_prefetch = 0 : i64, scratch_operands = 0 : i64, tpu.core_type = #tpu.core_type<tc>, window_params = [{transform_indices = @transform_0, window_bounds = array<i64: 16, 256>}, {pipeline_mode = #tpu.pipeline_mode<synchronous>, transform_indices = @transform_1, window_bounds = array<i64: 256, 32>}, {pipeline_mode = #tpu.pipeline_mode<synchronous>, transform_indices = @transform_2, window_bounds = array<i64: 1, 32>}, {pipeline_mode = #tpu.pipeline_mode<synchronous>, transform_indices = @transform_3, window_bounds = array<i64: 1, 32>}, {pipeline_mode = #tpu.pipeline_mode<synchronous>, transform_indices = @transform_4, window_bounds = array<i64: 1, 32>}, {transform_indices = @transform_5, window_bounds = array<i64: 16, 32>}]} {
    %c0 = arith.constant 0 : index
    %c0_0 = arith.constant 0 : index
    %0 = vector.load %arg1[%c0, %c0_0] : memref<16x256xbf16, #tpu.memory_space<vmem>>, vector<16x256xbf16>
    %c0_1 = arith.constant 0 : index
    %c0_2 = arith.constant 0 : index
    %1 = vector.load %arg2[%c0_1, %c0_2] : memref<256x32xbf16, #tpu.memory_space<vmem>>, vector<256x32xbf16>
    %cst = arith.constant dense<0.000000e+00> : vector<16x32xf32>
    %2 = tpu.matmul %0, %1, %cst {dimension_numbers = #tpu.dot_dimension_numbers<[1], [0], [0], [1], [0, 0, 1, 1], [], []>} : vector<16x256xbf16>, vector<256x32xbf16>, vector<16x32xf32> -> vector<16x32xf32>
    %c0_3 = arith.constant 0 : index
    %c0_4 = arith.constant 0 : index
    %3 = vector.load %arg3[%c0_3, %c0_4] : memref<1x32xf32, #tpu.memory_space<vmem>>, vector<1x32xf32>
    %4 = vector.broadcast %3 : vector<1x32xf32> to vector<16x32xf32>
    %5 = arith.addf %2, %4 : vector<16x32xf32>
    %cst_5 = arith.constant dense<0.000000e+00> : vector<16xf32>
    %6 = vector.multi_reduction <add>, %5, %cst_5 [1] : vector<16x32xf32> to vector<16xf32>
    %7 = vector.shape_cast %6 : vector<16xf32> to vector<16x1xf32>
    %cst_6 = arith.constant 3.200000e+01 : f32
    %8 = vector.broadcast %cst_6 : f32 to vector<16x1xf32>
    %9 = arith.divf %7, %8 : vector<16x1xf32>
    %10 = vector.broadcast %9 : vector<16x1xf32> to vector<16x32xf32>
    %11 = arith.subf %5, %10 : vector<16x32xf32>
    %12 = arith.mulf %11, %11 : vector<16x32xf32>
    %cst_7 = arith.constant dense<0.000000e+00> : vector<16xf32>
    %13 = vector.multi_reduction <add>, %12, %cst_7 [1] : vector<16x32xf32> to vector<16xf32>
    %14 = vector.shape_cast %13 : vector<16xf32> to vector<16x1xf32>
    %cst_8 = arith.constant 3.200000e+01 : f32
    %15 = vector.broadcast %cst_8 : f32 to vector<16x1xf32>
    %16 = arith.divf %14, %15 : vector<16x1xf32>
    %cst_9 = arith.constant 9.99999974E-6 : f32
    %17 = vector.broadcast %cst_9 : f32 to vector<16x1xf32>
    %18 = arith.addf %16, %17 : vector<16x1xf32>
    %19 = math.rsqrt %18 : vector<16x1xf32>
    %20 = vector.broadcast %19 : vector<16x1xf32> to vector<16x32xf32>
    %21 = arith.mulf %11, %20 : vector<16x32xf32>
    %c0_10 = arith.constant 0 : index
    %c0_11 = arith.constant 0 : index
    %22 = vector.load %arg4[%c0_10, %c0_11] : memref<1x32xf32, #tpu.memory_space<vmem>>, vector<1x32xf32>
    %23 = vector.broadcast %22 : vector<1x32xf32> to vector<16x32xf32>
    %24 = arith.mulf %21, %23 : vector<16x32xf32>
    %c0_12 = arith.constant 0 : index
    %c0_13 = arith.constant 0 : index
    %25 = vector.load %arg5[%c0_12, %c0_13] : memref<1x32xf32, #tpu.memory_space<vmem>>, vector<1x32xf32>
    %26 = vector.broadcast %25 : vector<1x32xf32> to vector<16x32xf32>
    %27 = arith.addf %24, %26 : vector<16x32xf32>
    %c0_14 = arith.constant 0 : index
    %c0_15 = arith.constant 0 : index
    %28 = vector.load %arg6[%c0_14, %c0_15] : memref<16x32xf32, #tpu.memory_space<vmem>>, vector<16x32xf32>
    tpu.vector_store %arg6[%c0_14, %c0_15], %27 {strides = array<i32>} : memref<16x32xf32, #tpu.memory_space<vmem>>, vector<16x32xf32>,
    return
  }
  func.func @transform_0(%arg0: i32) -> (i32, i32) {
    %c0_i32 = arith.constant 0 : i32
    %c0_i32_0 = arith.constant 0 : i32
    return %arg0, %c0_i32 : i32, i32
  }
  func.func @transform_1(%arg0: i32) -> (i32, i32) {
    %c0_i32 = arith.constant 0 : i32
    %c0_i32_0 = arith.constant 0 : i32
    %c0_i32_1 = arith.constant 0 : i32
    return %c0_i32, %c0_i32_0 : i32, i32
  }
  func.func @transform_2(%arg0: i32) -> (i32, i32) {
    %c0_i32 = arith.constant 0 : i32
    %c0_i32_0 = arith.constant 0 : i32
    %c0_i32_1 = arith.constant 0 : i32
    return %c0_i32, %c0_i32_0 : i32, i32
  }
  func.func @transform_3(%arg0: i32) -> (i32, i32) {
    %c0_i32 = arith.constant 0 : i32
    %c0_i32_0 = arith.constant 0 : i32
    %c0_i32_1 = arith.constant 0 : i32
    return %c0_i32, %c0_i32_0 : i32, i32
  }
  func.func @transform_4(%arg0: i32) -> (i32, i32) {
    %c0_i32 = arith.constant 0 : i32
    %c0_i32_0 = arith.constant 0 : i32
    %c0_i32_1 = arith.constant 0 : i32
    return %c0_i32, %c0_i32_0 : i32, i32
  }
  func.func @transform_5(%arg0: i32) -> (i32, i32) {
    %c0_i32 = arith.constant 0 : i32
    %c0_i32_0 = arith.constant 0 : i32
    return %arg0, %c0_i32 : i32, i32
  }
}

</mosaic_0001>

<bundles_post_ra>
// kernel: tpu_custom_call.1
= control target key start
LH: loop header
LB: loop body
LE: loop exit
PB: predicated region body
PF: predicated region fallthrough
CT: control target
= control target key end

     0   :  { %10 = vsyncpa [#allocation3], 0  ;;  %s926_s0 = inlined_call_operand.vmem [shape: bf16[32,256], index: 0, kind: input, shape index: {}]   ;;  %s927_s1 = inlined_call_operand.vmem [shape: bf16[256,32], index: 1, kind: input, shape index: {}]   ;;  %s928_s2 = inlined_call_operand.vmem [shape: f32[1,32], index: 2, kind: input, shape index: {}]   ;;  %s929_s3 = inlined_call_operand.vmem [shape: f32[1,32], index: 3, kind: input, shape index: {}]   ;;  %s930_s4 = inlined_call_operand.vmem [shape: f32[1,32], index: 4, kind: input, shape index: {}]   ;;  %s931_s5 = inlined_call_operand.hbm [shape: f32[32,32], index: 5, kind: output, shape index: {}]  }
   0x1   :  { %12 = vsyncpa [#allocation3 + $0x1], 0  ;;  %s761_s18 = smov 0   ;;  %s763_s19 = smov 0  }
   0x2   :  { %s765_s20 = smov 0   ;;  %s767_s21 = smov 0  }
   0x3 LB: > { %s782_s22 = sadd.s32 4294967295, %s726_s21   ;;  %s542_s23 = sadd.s32 4294967294, %s726_s21   ;;  %s726_s21 = sphi %s767_s21, %s937_s21   ;;  %s722_s20 = sphi %s765_s20, %s936_s20   ;;  %s718_s19 = sphi %s763_s19, %s935_s19   ;;  %s714_s18 = sphi %s761_s18, %s934_s18  }
   0x4   : > { %s786_s24 = sadd.s32 1, %s726_s21   ;;  %s135_s25 = sadd.s32 1, %s722_s20 }
   0x5   : > { %s132_s26 = ssub.s32 %s726_s21, %s786_s24  ;;  %p145_p0 = scmp.ne.s32.totalorder %s722_s20, %s718_s19 }
   0x6   : > { %p133_p1 = scmp.eq.s32.totalorder %s132_s26, 0  ;;  %p146_p2 = scmp.eq.s32.totalorder %s782_s22, 1 }
   0x7   : > { %p151_p3 = scmp.ne.s32.totalorder %s718_s19, %s714_s18  ;;  %p152_p4 = scmp.eq.s32.totalorder %s542_s23, 1 }
   0x8   : > { %s797_s27 = scalar_select %p133_p1, %s722_s20, %s135_s25  }
   0x9   : > { %p799_p5 = por %p146_p2, %p145_p0  ;;  %p803_p6 = por %p152_p4, %p151_p3 }
   0xa   : > { %p545_p7 = scmp.ge.s32.totalorder %s726_s21, 1  ;;  %p192_p8 = scmp.lt.s32.totalorder %s726_s21, 3 }
   0xc   : > { %p193_p9 = pnand %p545_p7, %p192_p8 }
   0xd   : > { %v641_v0 = vld [vmem:[%s927_s1 + $0x40] sm:$0xff] (!%p193_p9)   ;;  %s547_s7 = sshll.u32 (!%p193_p9), %s782_s22, 1  ;;  %v643_v2 = vld [vmem:[%s927_s1 + $0x48] sm:$0xff] (!%p193_p9)   ;;  %v645_v4 = vld [vmem:[%s927_s1 + $0x50] sm:$0xff] (!%p193_p9)   ;;  %vm418_vm0 = vcmask (!%p193_p9), 261120   ;;  %s577_s23 = sshll.u32 (!%p193_p9), %s782_s22, 8 }
   0xe   : > { %196 = sbr.rel (%p193_p9) target bundleno = 595 (0x253), region = 40  ;;  %v642_v1 = vld [vmem:[%s927_s1] sm:$0xff] (!%p193_p9)   ;;  %578 = vmatprep.subr.bf16.mxu0 (!%p193_p9), %v641_v0  ;;  %v644_v3 = vld [vmem:[%s927_s1 + $0x8] sm:$0xff] (!%p193_p9)   ;;  %p222_p10 = scmp.lt.s32.totalorder (!%p193_p9), %s547_s7, 3  ;;  %v646_v5 = vld [vmem:[%s927_s1 + $0x10] sm:$0xff] (!%p193_p9)  }
   0xf   : > { %579 = vmatpush3.bf16.msra.mxu0 (!%p193_p9), %v642_v1  ;;  %v647_v6 = vld [vmem:[%s927_s1 + $0x58] sm:$0xff] (!%p193_p9)   ;;  %v649_v8 = vld [vmem:[%s927_s1 + $0x60] sm:$0xff] (!%p193_p9)   ;;  %v651_v10 = vld [vmem:[%s927_s1 + $0x68] sm:$0xff] (!%p193_p9)   ;;  %s880_s8 = scalar_lea.hbm (!%p193_p9), %s931_s5, %s577_s23  ;;  %s728_s10 = smov (!%p193_p9), [#allocation2]  }
  0x10   : > { %580 = vmatprep.subr.bf16.mxu0 (!%p193_p9), %v643_v2  ;;  %v648_v7 = vld [vmem:[%s927_s1 + $0x18] sm:$0xff] (!%p193_p9)   ;;  %v650_v9 = vld [vmem:[%s927_s1 + $0x20] sm:$0xff] (!%p193_p9)   ;;  %v652_v12 = vld [vmem:[%s927_s1 + $0x28] sm:$0xff] (!%p193_p9)   ;;  %s668_s11 = sshll.u32 (!%p193_p9), %s728_s10, 4  ;;  %s669_s11 = int_to_ptr.vmem [resolvable:$false] %s668_s11 }
  0x11   : > { %v653_v13 = vld [vmem:[%s927_s1 + $0x70] sm:$0xff] (!%p193_p9)   ;;  %v655_v15 = vld [vmem:[%s927_s1 + $0x78] sm:$0xff] (!%p193_p9)   ;;  %v550_v20 = vld [vmem:[%s928_s2] ss:$0 sm:$0xff] (!%p193_p9)  ;;  %s670_s13 = scalar_lea.vmem (!%p193_p9), %s669_s11, 512 }
  0x12   : > { %v654_v14 = vld [vmem:[%s927_s1 + $0x30] sm:$0xff] (!%p193_p9)   ;;  %v656_v16 = vld [vmem:[%s927_s1 + $0x38] sm:$0xff] (!%p193_p9)   ;;  %v569_v46 = vld [vmem:[%s929_s3] ss:$0 sm:$0xff] (!%p193_p9) }
  0x13   : > { %581 = vmatpush3.bf16.msra.mxu0 (!%p193_p9), %v644_v3  ;;  %v570_v48 = vld [vmem:[%s930_s4] ss:$0 sm:$0xff] (!%p193_p9) }
  0x14   : > { %582 = vmatprep.subr.bf16.mxu0 (!%p193_p9), %v645_v4 }
  0x15   : > { %s939_s7 = smov (!%p222_p10, %s547_s7), 3 }
  0x16   : > { %s576_s6 = sshll.u32 %s939_s7, 3 }
  0x17   : > { %583 = vmatpush3.bf16.msra.mxu0 %v646_v5  ;;  %s226_s12 = scalar_lea.vmem %s926_s0, %s576_s6 }
  0x18   : > { %584 = vmatprep.subr.bf16.mxu0 %v647_v6  ;;  %v659_v11 = vld [vmem:[%s226_s12 + $0x4] ss:$8 sps:$4 sm:$0xff]   ;;  %v657_v17 = vld [vmem:[%s226_s12] ss:$8 sps:$4 sm:$0xff]   ;;  %s218_s12 = sand.u32 1, %s718_s19  }
  0x19   : > { %409 = vmatprep.mubr.bf16.mxu0 %v659_v11  ;;  %s546_s16 = sshll.u32 %s218_s12, 4  ;;  %s885_s9 = scalar_lea.sflag [#allocation3], %s218_s12 }
  0x1a   : > { %s220_s25 = scalar_lea.vmem [#allocation2], %s546_s16 }
  0x1b   : > { %585 = vmatpush3.bf16.msra.mxu0 %v648_v7  ;;  %s480_s26 = sshll.u32 %s220_s25, 4  ;;  %s882_s26 = int_to_ptr.vmem [resolvable:$true] %s480_s26 }
  0x1c   : > { %586 = vmatprep.subr.bf16.mxu0 %v649_v8  ;;  %s664_s22 = scalar_lea.vmem %s882_s26, 256  ;;  %p671_p0 = scmp.lt.s32.totalorder %s882_s26, %s669_s11 }
  0x1d   : > { %p665_p11 = scmp.ne.s32.totalorder %s882_s26, %s664_s22  ;;  %p672_p1 = scmp.lt.s32.totalorder %s670_s13, %s664_s22 }
  0x1f   : > { %587 = vmatpush3.bf16.msra.mxu0 %v650_v9  ;;  %p666_p12 = pnand %p665_p11, %p799_p5  ;;  %p673_p2 = por %p672_p1, %p671_p0 }
  0x20   : > { %588 = vmatprep.subr.bf16.mxu0 %v651_v10 }
  0x21   : > { %p667_p13 = pneg %p666_p12 }
  0x23   : > { %589 = vmatpush3.bf16.msra.mxu0 %v652_v12  ;;  %p674_p3 = pnand %p673_p2, %p667_p13 }
  0x24   : > { %590 = vmatprep.subr.bf16.mxu0 %v653_v13 }
  0x27   : > { %591 = vmatpush3.bf16.msra.mxu0 %v654_v14 }
  0x28   : > { %592 = vmatprep.subr.bf16.mxu0 %v655_v15 }
  0x2b   : > { %593 = vmatpush3.bf16.msra.mxu0 %v656_v16 }
  0x2e   : > { %410 = vmatmul.mubr.bf16.vlgmr.msra.gmra.mrb[0].mxu0 %v657_v17 }
 0x101   : > { %v594_v18 = vpop.f32.mrb[0].mxu0 }
 0x102   : > { %v595_v19 = vpop.f32.mrb[1].mxu0 }
 0x103   : > { %v596_v21 = vadd.f32 %v595_v19, %v594_v18  ;;  %v597_v22 = vpop.f32.mrb[2].mxu0 }
 0x104   : > { %v598_v23 = vpop.f32.mrb[3].mxu0 }
 0x105   : > { %v599_v24 = vadd.f32 %v598_v23, %v597_v22  ;;  %v412_v25 = vadd.f32 %v596_v21, %v550_v20 }
 0x107   : > { %v419_v26 = vsel %vm418_vm0, %v412_v25, 0.0  ;;  %v415_v27 = vadd.f32 %v599_v24, %v550_v20 }
 0x108   : > { %420 = vadd.xlane.f32.xlu0 %v419_v26 }
 0x109   : > { %v422_v28 = vsel %vm418_vm0, %v415_v27, 0.0 }
 0x10c   : > { %423 = vadd.xlane.f32.xlu0 %v422_v28 }
 0x195   : > { %v421_v29 = vpop.xlane.xlu0 %420 }
 0x196   : > { %v426_v30 = vmul.f32 0.03125, %v421_v29 }
 0x198   : > { %v428_v31 = vsub.f32 %v412_v25, %v426_v30 }
 0x199   : > { %v424_v32 = vpop.xlane.xlu0 %423 }
 0x19a   : > { %v427_v33 = vmul.f32 0.03125, %v424_v32  ;;  %v430_v34 = vmul.f32 %v428_v31, %v428_v31 }
 0x19c   : > { %v429_v35 = vsub.f32 %v415_v27, %v427_v33  ;;  %v432_v36 = vsel %vm418_vm0, %v430_v34, 0.0 }
 0x19d   : > { %433 = vadd.xlane.f32.xlu1 %v432_v36 }
 0x19e   : > { %v431_v37 = vmul.f32 %v429_v35, %v429_v35 }
 0x1a0   : > { %v435_v38 = vsel %vm418_vm0, %v431_v37, 0.0 }
 0x1a1   : > { %436 = vadd.xlane.f32.xlu1 %v435_v38 }
 0x22a   : > { %v434_v39 = vpop.xlane.xlu1 %433 }
 0x22b   : > { %v438_v40 = vmul.f32 0.03125, %v434_v39 }
 0x22d   : > { %v440_v41 = vadd.f32 1e-05, %v438_v40 }
 0x22e   : > { %v437_v42 = vpop.xlane.xlu1 %436 }
 0x22f   : > { %660 = vrsqrt.f32 %v440_v41  ;;  %v439_v43 = vmul.f32 0.03125, %v437_v42 }
 0x231   : > { %v441_v44 = vadd.f32 1e-05, %v439_v43 }
 0x233   : > { %662 = vrsqrt.f32 %v441_v44 }
 0x239   : > { %v661_v45 = vpop.eup %660 }
 0x23a   : > { %v444_v47 = vmul.f32 %v661_v45, %v428_v31 }
 0x23c   : > { %v453_v49 = vmul.f32 %v569_v46, %v444_v47 }
 0x23d   : > { %v663_v50 = vpop.eup %662 }
 0x23e   : > { %v445_v51 = vmul.f32 %v663_v50, %v429_v35  ;;  %v462_v52 = vadd.f32 %v570_v48, %v453_v49 }
 0x240   : > { %v454_v53 = vmul.f32 %v569_v46, %v445_v51  ;;  %464 = vst.msk [vmem:[%s220_s25] sm:$0xff] %vm418_vm0, %v462_v52 }
 0x242   : > { %v463_v54 = vadd.f32 %v570_v48, %v454_v53 }
 0x244   : > { %465 = vst.msk [vmem:[%s220_s25 + $0x8] sm:$0xff] %vm418_vm0, %v463_v54 }
 0x245   : > { %677 = shalt.err (!%p674_p3)
}
 0x246   : > { %s678_s12 = scalar_lea.hbm %s880_s8, 256  ;;  %s682_s16 = scalar_lea.hbm %s931_s5, 512 }
 0x247   : > { %p679_p4 = scmp.ne.s32.totalorder %s880_s8, %s678_s12  ;;  %p683_p9 = scmp.lt.u32.totalorder %s880_s8, %s931_s5 }
 0x248   : > { %p684_p10 = scmp.lt.u32.totalorder %s682_s16, %s678_s12  ;;  %p686_p12 = scmp.lt.u32.totalorder %s678_s12, %s880_s8 }
 0x249   : > { %p680_p7 = pnand %p679_p4, %p799_p5 }
 0x24a   : > { %p685_p11 = por %p684_p10, %p683_p9 }
 0x24b   : > { %p681_p8 = pneg %p680_p7 }
 0x24c   : > { %p687_p13 = por %p686_p12, %p685_p11 }
 0x24e   : > { %p688_p0 = pnand %p687_p13, %p681_p8 }
 0x250   : > { %691 = shalt.err (!%p688_p0)
}
 0x251   : > { %s729_s23 = smov 128   ;;  %s730_s25 = smov 8  }
 0x252   : > { %600 = dma.vmem_to_hbm [thread:$0]  (%p799_p5), %s882_s26, 256, %s880_s8, %s885_s9, %s729_s23, %s729_s23, %s730_s25  }
 0x253 PF: > { %p606_p1 = scmp.ge.s32.totalorder %s726_s21, 2  ;;  %s495_s30 = sand.u32 1, %s714_s18  }
 0x254   : > { %s496_s6 = scalar_lea.sflag [#allocation3], %s495_s30 }
 0x255   : > { %p603_p2 = pnand %p606_p1, %p803_p6 }
 0x257   : > { %709 = dma.done.wait (!%p603_p2), %s496_s6, 256  }
 0x258   : > { %711 = vsyncadd (!%p603_p2), %s496_s6, 4294967040  ;;  %p15_p3 = scmp.ge.s32.totalorder %s786_s24, 4   ;;  %s934_s18 = smov %s718_s19 }
 0x259   : > { %s935_s19 = smov %s722_s20  ;;  %s936_s20 = smov %s797_s27 }
 0x25a   : > { %s937_s21 = smov %s786_s24  ;;  %17 = sbr.rel (!%p15_p3) target bundleno = 3 (0x3), region = 75 }
 0x261   :  { %501 = vsyncpa [#allocation3], 1 }
 0x262   :  { %503 = vsyncpa [#allocation3 + $0x1], 1 }

</bundles_post_ra>
